<compile_context>
chip_gen: v7x
topology: tpu7x:2x2x1
jax: 0.10.0
libtpu: 0.0.40
codegen_flags: <defaults>
</compile_context>

<pallas_src>
import jax
import jax.numpy as jnp
from jax.experimental import pallas as pl
from jax.experimental.pallas import tpu as pltpu

OUT_H = 384
OUT_W = 384


def _make_kernel(nc_total, block_rows, chunk_rows, n_chunks, needs_mask):
    """Weighted sum-of-squared-errors over one (block_rows, HW) block."""

    def kernel(w_ref, pred_ref, gt_ref, out_ref):
        hw = pred_ref.shape[1]
        row_base = pl.program_id(0) * block_rows

        def chunk_sum(r0, acc):
            p = pred_ref[pl.ds(r0, chunk_rows), :].astype(jnp.float32)
            g = gt_ref[pl.ds(r0, chunk_rows), :].astype(jnp.float32)
            d = p - g
            if needs_mask:
                # zero out rows past NC (last, ragged block reads padding)
                rows = row_base + r0 + jax.lax.broadcasted_iota(
                    jnp.int32, (chunk_rows, hw), 0)
                d = jnp.where(rows < nc_total, d, 0.0)
            return acc + d * d

        acc = jnp.zeros((chunk_rows, hw), jnp.float32)
        if n_chunks <= 8:
            for c in range(n_chunks):          # static unroll, short trip count
                acc = chunk_sum(c * chunk_rows, acc)
        else:
            acc = jax.lax.fori_loop(
                0, n_chunks,
                lambda c, a: chunk_sum(
                    pl.multiple_of(c * chunk_rows, chunk_rows), a),
                acc)

        # Reduce over sublanes first, then one weight multiply per column,
        # then the cross-lane reduce (saves a per-element vmul and the
        # sublane broadcast of the (1, HW) weight row).
        col = jnp.sum(acc, axis=0, keepdims=True)            # (1, HW)
        out_ref[0, 0] = jnp.sum(w_ref[...] * col)

    return kernel


def localmse2(pred, gt, mask):
    """Pallas implementation of localmse2.forward(pred, gt, mask)."""
    N, C, H, W = pred.shape
    NC = N * C
    HW = H * W
    itemsize = jnp.dtype(pred.dtype).itemsize

    # ---- glue: mask bounding box (one pass over mask; rest is tiny) --------
    nz_hw = jnp.any(mask != 0, axis=(0, 1))                    # (H, W)
    any_h = jnp.any(nz_hw, axis=1)                             # (H,)
    any_w = jnp.any(nz_hw, axis=0)                             # (W,)
    i2 = jnp.argmax(any_h).astype(jnp.int32)
    x2 = (H - 1 - jnp.argmax(any_h[::-1])).astype(jnp.int32)
    i3 = jnp.argmax(any_w).astype(jnp.int32)
    x3 = (W - 1 - jnp.argmax(any_w[::-1])).astype(jnp.int32)
    # TODO(synk): all-zero / single-row / single-column masks (empty crop)
    # silently diverge from PyTorch, which would raise on the empty interpolate.

    # PyTorch crops [i2:x2, i3:x3] (end EXCLUSIVE -> off-by-one kept), then
    # nearest-resizes: src = min(floor(dst * float32(in/out)), in - 1).
    ch = x2 - i2
    cw = x3 - i3
    oh = jnp.arange(OUT_H, dtype=jnp.float32)
    ow = jnp.arange(OUT_W, dtype=jnp.float32)
    src_h = i2 + jnp.minimum(
        jnp.floor(oh * (ch.astype(jnp.float32) / OUT_H)).astype(jnp.int32),
        ch - 1)
    src_w = i3 + jnp.minimum(
        jnp.floor(ow * (cw.astype(jnp.float32) / OUT_W)).astype(jnp.int32),
        cw - 1)

    # Count-weights: cnt_h[h] = #output rows selecting source row h, etc.
    cnt_h = jnp.sum(src_h[:, None] == jnp.arange(H, dtype=jnp.int32)[None, :],
                    axis=0).astype(jnp.float32)                # (H,)
    cnt_w = jnp.sum(src_w[:, None] == jnp.arange(W, dtype=jnp.int32)[None, :],
                    axis=0).astype(jnp.float32)                # (W,)
    w_hw = (cnt_h[:, None] * cnt_w[None, :]).reshape(1, HW)    # sums to 384*384

    # ---- lane-dense layout, native dtype (upcast happens in-kernel) --------
    pred_f = pred.reshape(NC, HW)
    gt_f = gt.reshape(NC, HW)

    # ---- generation-aware block sizing (no jnp.pad: tail masked in-kernel) -
    try:
        vmem_cap = int(getattr(pltpu.get_tpu_info(), "vmem_capacity_bytes",
                               64 << 20))
    except Exception:  # interpret mode / info unavailable -> safest assumption
        vmem_cap = 64 << 20
    vmem_limit = int(min(max(vmem_cap // 2, 32 << 20), 48 << 20))

    sub = max(8, 32 // itemsize)          # sublane tile: 8 f32 / 16 bf16 / 32 i8
    nc_pad = -(-NC // sub) * sub
    row_bytes = HW * itemsize

    # Rows per in-kernel chunk: ~64 KiB of f32 temporaries, sublane-aligned.
    chunk_rows = max(sub, ((64 << 10) // max(1, HW * 4)) // sub * sub)
    chunk_rows = min(chunk_rows, nc_pad)

    # Per-input block bytes: 2 inputs x 2 pipeline buffers + double-buffered
    # weight row + chunk temporaries, with ~25% headroom under vmem_limit.
    usable = (vmem_limit * 3) // 4
    per_input = max(chunk_rows * row_bytes,
                    min(8 << 20, (usable - 2 * HW * 4) // 4))
    B = max(chunk_rows,
            (per_input // max(1, row_bytes)) // chunk_rows * chunk_rows)
    B = min(B, -(-nc_pad // chunk_rows) * chunk_rows)
    # Keep >= 2 grid blocks when there is enough data (v7x: 2 TensorCores).
    if nc_pad >= 2 * chunk_rows:
        B = min(B, max(chunk_rows, (nc_pad // (2 * chunk_rows)) * chunk_rows))
    num_blocks = -(-NC // B)
    n_chunks = B // chunk_rows
    needs_mask = (num_blocks * B != NC)

    cost = pl.CostEstimate(
        flops=3 * NC * HW + 2 * HW,
        transcendentals=0,
        bytes_accessed=2 * NC * HW * itemsize + HW * 4 + num_blocks * 4,
    )

    kernel = _make_kernel(NC, B, chunk_rows, n_chunks, needs_mask)

    partials = pl.pallas_call(
        kernel,
        out_shape=jax.ShapeDtypeStruct((num_blocks, 1), jnp.float32),
        grid_spec=pltpu.PrefetchScalarGridSpec(
            num_scalar_prefetch=0,
            grid=(num_blocks,),
            in_specs=[
                # constant block index -> fetched once (its 2*HW*4 bytes of
                # pipeline buffering are accounted for in the budget above)
                pl.BlockSpec((1, HW), lambda b: (0, 0)),   # weights
                pl.BlockSpec((B, HW), lambda b: (b, 0)),   # pred block
                pl.BlockSpec((B, HW), lambda b: (b, 0)),   # gt block
            ],
            out_specs=pl.BlockSpec(
                (1, 1), lambda b: (b, 0),
                memory_space=pltpu.MemorySpace.SMEM),
        ),
        compiler_params=pltpu.CompilerParams(
            dimension_semantics=("parallel",),
            vmem_limit_bytes=vmem_limit),
        cost_estimate=cost,
    )(w_hw, pred_f, gt_f)

    return jnp.sum(partials) / jnp.float32(NC * OUT_H * OUT_W)


def _ref_localmse2(pred, gt, mask):
    """Pure-JAX reference mirroring the PyTorch forward (for checking)."""
    N, C, H, W = pred.shape
    nz_hw = jnp.any(mask != 0, axis=(0, 1))
    any_h = jnp.any(nz_hw, axis=1)
    any_w = jnp.any(nz_hw, axis=0)
    i2 = jnp.argmax(any_h)
    x2 = H - 1 - jnp.argmax(any_h[::-1])
    i3 = jnp.argmax(any_w)
    x3 = W - 1 - jnp.argmax(any_w[::-1])
    ch = x2 - i2
    cw = x3 - i3
    oh = jnp.arange(OUT_H, dtype=jnp.float32)
    ow = jnp.arange(OUT_W, dtype=jnp.float32)
    src_h = i2 + jnp.minimum(
        jnp.floor(oh * (ch.astype(jnp.float32) / OUT_H)).astype(jnp.int32),
        ch - 1)
    src_w = i3 + jnp.minimum(
        jnp.floor(ow * (cw.astype(jnp.float32) / OUT_W)).astype(jnp.int32),
        cw - 1)
    cp = pred[:, :, src_h[:, None], src_w[None, :]]
    cg = gt[:, :, src_h[:, None], src_w[None, :]]
    return jnp.mean((cp - cg) ** 2)


if __name__ == "__main__":
    N, C, H, W = 2, 4, 16, 16
    key = jax.random.PRNGKey(0)
    k1, k2 = jax.random.split(key)
    pred = jax.random.normal(k1, (N, C, H, W), dtype=jnp.float32)
    gt = jax.random.normal(k2, (N, C, H, W), dtype=jnp.float32)

    # Mask is nonzero on a rectangle -> bounding box rows [3, 11], cols [5, 13].
    mask = jnp.zeros((N, C, H, W), dtype=jnp.float32)
    mask = mask.at[:, :, 3:12, 5:14].set(1.0)

    loss = jax.jit(localmse2)(pred, gt, mask)
    loss = jax.block_until_ready(loss)

    ref = _ref_localmse2(pred, gt, mask)
    assert jnp.allclose(loss, ref, rtol=1e-5, atol=1e-6), (float(loss), float(ref))
    print("KERNEL_OK")
</pallas_src>

<mosaic_0001>
module attributes {stable_mosaic.version = 11 : i64} {
  func.func @kernel(%arg0: i32, %arg1: memref<1x256xf32, #tpu.memory_space<vmem>>, %arg2: memref<8x256xf32, #tpu.memory_space<vmem>>, %arg3: memref<8x256xf32, #tpu.memory_space<vmem>>, %arg4: memref<1x1xf32, #tpu.memory_space<smem>>) attributes {dimension_semantics = [#tpu.dimension_semantics<parallel>], iteration_bounds = array<i64: 1>, scalar_prefetch = 0 : i64, scratch_operands = 0 : i64, tpu.core_type = #tpu.core_type<tc>, window_params = [{pipeline_mode = #tpu.pipeline_mode<synchronous>, transform_indices = @transform_0, window_bounds = array<i64: 1, 256>}, {transform_indices = @transform_1, window_bounds = array<i64: 8, 256>}, {transform_indices = @transform_2, window_bounds = array<i64: 8, 256>}, {transform_indices = @transform_3, window_bounds = array<i64: 1, 1>}]} {
    %cst = arith.constant 0.000000e+00 : f32
    %0 = vector.broadcast %cst : f32 to vector<8x256xf32>
    %c0 = arith.constant 0 : index
    %c0_0 = arith.constant 0 : index
    %1 = vector.load %arg2[%c0, %c0_0] : memref<8x256xf32, #tpu.memory_space<vmem>>, vector<8x256xf32>
    %c0_1 = arith.constant 0 : index
    %c0_2 = arith.constant 0 : index
    %2 = vector.load %arg3[%c0_1, %c0_2] : memref<8x256xf32, #tpu.memory_space<vmem>>, vector<8x256xf32>
    %3 = arith.subf %1, %2 : vector<8x256xf32>
    %4 = arith.mulf %3, %3 : vector<8x256xf32>
    %5 = arith.addf %0, %4 : vector<8x256xf32>
    %cst_3 = arith.constant dense<0.000000e+00> : vector<256xf32>
    %6 = vector.multi_reduction <add>, %5, %cst_3 [0] : vector<8x256xf32> to vector<256xf32>
    %7 = vector.shape_cast %6 : vector<256xf32> to vector<1x256xf32>
    %c0_4 = arith.constant 0 : index
    %c0_5 = arith.constant 0 : index
    %8 = vector.load %arg1[%c0_4, %c0_5] : memref<1x256xf32, #tpu.memory_space<vmem>>, vector<1x256xf32>
    %9 = arith.mulf %8, %7 : vector<1x256xf32>
    %10 = vector.shape_cast %9 : vector<1x256xf32> to vector<1x1x256xf32>
    %cst_6 = arith.constant dense<0.000000e+00> : vector<1xf32>
    %11 = vector.multi_reduction <add>, %10, %cst_6 [1, 2] : vector<1x1x256xf32> to vector<1xf32>
    %12 = vector.shape_cast %11 : vector<1xf32> to vector<1x1x1xf32>
    %13 = vector.extract %12[0, 0, 0] : f32 from vector<1x1x1xf32>
    %c0_7 = arith.constant 0 : index
    %c0_8 = arith.constant 0 : index
    %14 = memref.load %arg4[%c0_7, %c0_8] : memref<1x1xf32, #tpu.memory_space<smem>>
    memref.store %13, %arg4[%c0_7, %c0_8] : memref<1x1xf32, #tpu.memory_space<smem>>
    return
  }
  func.func @transform_0(%arg0: i32) -> (i32, i32) {
    %c0_i32 = arith.constant 0 : i32
    %c0_i32_0 = arith.constant 0 : i32
    %c0_i32_1 = arith.constant 0 : i32
    return %c0_i32, %c0_i32_0 : i32, i32
  }
  func.func @transform_1(%arg0: i32) -> (i32, i32) {
    %c0_i32 = arith.constant 0 : i32
    %c0_i32_0 = arith.constant 0 : i32
    return %arg0, %c0_i32 : i32, i32
  }
  func.func @transform_2(%arg0: i32) -> (i32, i32) {
    %c0_i32 = arith.constant 0 : i32
    %c0_i32_0 = arith.constant 0 : i32
    return %arg0, %c0_i32 : i32, i32
  }
  func.func @transform_3(%arg0: i32) -> (i32, i32) {
    %c0_i32 = arith.constant 0 : i32
    %c0_i32_0 = arith.constant 0 : i32
    return %arg0, %c0_i32 : i32, i32
  }
}

</mosaic_0001>

<bundles_post_ra>
// kernel: localmse2.1
= control target key start
LH: loop header
LB: loop body
LE: loop exit
PB: predicated region body
PF: predicated region fallthrough
CT: control target
= control target key end

     0   :  { %s161_s0 = inlined_call_operand.vmem [shape: f32[1,256], index: 0, kind: input, shape index: {}]   ;;  %s162_s1 = inlined_call_operand.vmem [shape: f32[8,256], index: 1, kind: input, shape index: {}]   ;;  %s163_s2 = inlined_call_operand.vmem [shape: f32[8,256], index: 2, kind: input, shape index: {}]   ;;  %s164_s3 = inlined_call_operand.hbm [shape: f32[1,1], index: 3, kind: output, shape index: {}]  }
   0x1   :  { %v15_v0 = vld [vmem:[%s162_s1] sm:$0xff]  ;;  %v16_v1 = vld [vmem:[%s162_s1 + $0x8] sm:$0xff] }
   0x2   :  { %v17_v2 = vld [vmem:[%s163_s2] sm:$0xff]  ;;  %v18_v3 = vld [vmem:[%s163_s2 + $0x8] sm:$0xff] }
   0x3   :  { %v19_v4 = vsub.f32 %v15_v0, %v17_v2 }
   0x4   :  { %8 = vsyncpa [#allocation3], 0  ;;  %v20_v5 = vsub.f32 %v16_v1, %v18_v3  ;;  %v112_v12 = vmov 1966171168   ;;  %v44_v14 = vlaneseq  ;;  %v37_v28 = vld [vmem:[%s161_s0] sm:$0x3] }
   0x5   :  { %v21_v6 = vmul.f32 %v19_v4, %v19_v4  ;;  %v42_v13 = vunpack.c.l.s4 %v112_v12  ;;  %vm68_vm0 = vcmask 1040384   ;;  %s100_s22 = scalar_lea.hbm %s164_s3, 16 }
   0x6   :  { %v22_v7 = vmul.f32 %v20_v5, %v20_v5  ;;  %v45_v20 = vshrl.u32 %v44_v14, 7  ;;  %p101_p0 = scmp.ne.s32.totalorder %s164_s3, %s100_s22  ;;  %p104_p1 = scmp.lt.u32.totalorder %s100_s22, %s164_s3 }
   0x7   :  { %v25_v8 = vrot.slane %v21_v6, 4  ;;  %v43_v19 = vunpack.c.0.s8 %v42_v13 }
   0x8   :  { %v31_v9 = vrot.slane %v22_v7, 4  ;;  %v60_v30 = vsub.s32 0, %v45_v20  ;;  %v64_v31 = vsub.s32 1, %v45_v20  ;;  %p106_p2 = pnand %p104_p1, %p101_p0 }
   0x9   :  { %v26_v10 = vadd.f32 %v25_v8, %v21_v6  ;;  %v46_v25 = vsub.s32 %v43_v19, %v45_v20 }
   0xa   :  { %v32_v11 = vadd.f32 %v31_v9, %v22_v7 }
   0xb   :  { %v27_v15 = vrot.slane %v26_v10, 2 }
   0xc   :  { %v33_v16 = vrot.slane %v32_v11, 2 }
   0xd   :  { %v28_v17 = vadd.f32 %v27_v15, %v26_v10 }
   0xe   :  { %v34_v18 = vadd.f32 %v33_v16, %v32_v11 }
   0xf   :  { %v29_v21 = vrot.slane %v28_v17, 1 }
  0x10   :  { %v35_v22 = vrot.slane %v34_v18, 1 }
  0x11   :  { %v30_v23 = vadd.f32 %v29_v21, %v28_v17 }
  0x12   :  { %v36_v24 = vadd.f32 %v35_v22, %v34_v18 }
  0x14   :  { %v40_v26 = vcombine.low %v30_v23, %v36_v24 }
  0x16   :  { %v47_v27 = vrot.slane %v40_v26, %v46_v25 }
  0x18   :  { %v54_v29 = vrot.slane %v47_v27, %v46_v25 }
  0x1a   :  { %v56_v32 = vmul.f32 %v54_v29, %v37_v28 }
  0x1c   :  { %v61_v33 = vrot.slane %v56_v32, %v60_v30  ;;  %v65_v34 = vrot.slane %v56_v32, %v64_v31 }
  0x1e   :  { %v69_v35 = vsel %vm68_vm0, %v61_v33, 0.0  ;;  %v70_v36 = vsel %vm68_vm0, %v65_v34, 0.0 }
  0x1f   :  { %v71_v37 = vadd.f32 %v70_v36, %v69_v35 }
  0x21   :  { %72 = vadd.xlane.f32.xlu0 %v71_v37 }
  0xae   :  { %v73_v38 = vpop.xlane.xlu0 %72 }
  0xaf   :  { %v74_v39 = vrot.slane %v73_v38, 4 }
  0xb1   :  { %v75_v40 = vadd.f32 %v74_v39, %v73_v38 }
  0xb3   :  { %v76_v41 = vrot.slane %v75_v40, 2 }
  0xb5   :  { %v77_v42 = vadd.f32 %v76_v41, %v75_v40 }
  0xb7   :  { %v78_v43 = vrot.slane %v77_v42, 1 }
  0xb9   :  { %v79_v44 = vadd.f32 %v78_v43, %v77_v42 }
  0xbb   :  { %96 = vpush %v79_v44 }
  0xec   :  { %s97_s0 = spop %96 }
  0xed   :  { %82 = sst [smem:[#allocation2]] %s97_s0 }
  0xee   :  { %109 = shalt.err (!%p106_p2)
}
  0xef   :  { %s113_s27 = smov [#allocation2]  }
  0xf0   :  { %90 = dma.smem_to_hbm %s113_s27, 16, %s164_s3, [#allocation3]  }
  0xf1   :  { %110 = dma.done.wait [#allocation3], 16  }
  0xf2   :  { %111 = vsyncadd [#allocation3], 4294967280 }
  0xf3   :  { %94 = sfence }
  0xf4   :  { %95 = vsyncpa [#allocation3], 1 }

</bundles_post_ra>
